<compile_context>
chip_gen: v7x
topology: tpu7x:2x2x1
jax: 0.10.0
libtpu: 0.0.40
codegen_flags: <defaults>
</compile_context>

<pallas_src>
import jax
import jax.numpy as jnp
from jax.experimental import pallas as pl
from jax.experimental.pallas import tpu as pltpu


def _round_up(n, m):
    return ((n + m - 1) // m) * m


def mlp_kernel(x_ref, w1_ref, b1_ref, w2_ref, b2_ref, o_ref):
    # fc1: (TB, D_in) @ (D_in, H) -> f32 accumulation on the MXU
    h = jnp.dot(x_ref[...], w1_ref[...], preferred_element_type=jnp.float32)
    # bias + ReLU in f32 on the VPU
    h = jnp.maximum(h + b1_ref[...], 0.0)
    # fc2: cast activations to the weight dtype (no-op in the f32 path)
    logits = jnp.dot(h.astype(w2_ref.dtype), w2_ref[...],
                     preferred_element_type=jnp.float32)
    logits = logits + b2_ref[...]
    # Sigmoid lowers to the EUP logistic unit (keeps the divide off the VPU).
    o_ref[...] = jax.nn.sigmoid(logits).astype(o_ref.dtype)


def net_forward(x, w1, b1, w2, b2, *, max_batch_tile=2048, use_bf16=False):
    """Forward pass of Net as a single gridded Pallas kernel.

    x: (B, input_dim) float32
    w1: (input_dim, hidden_dim), b1: (1, hidden_dim)
    w2: (hidden_dim, output_dim), b2: (1, output_dim)
    """
    B, D_in = x.shape
    H = w1.shape[1]
    D_out = w2.shape[1]

    # Batch tile: largest multiple of 8 (sublane) up to max_batch_tile.
    tile = min(max_batch_tile, _round_up(B, 8))
    b_pad = _round_up(B, tile)
    if b_pad != B:
        x = jnp.pad(x, ((0, b_pad - B), (0, 0)))

    # Optional bf16 matmul inputs (halves x DMA bytes on v6e/v7x). Biases and all
    # elementwise math stay f32.
    mm_dtype = jnp.bfloat16 if use_bf16 else jnp.float32
    x_in = x.astype(mm_dtype)
    w1_in = w1.astype(mm_dtype)
    w2_in = w2.astype(mm_dtype)
    b1_in = b1.astype(jnp.float32)
    b2_in = b2.astype(jnp.float32)

    grid = (b_pad // tile,)

    itemsize = jnp.dtype(mm_dtype).itemsize
    cost = pl.CostEstimate(
        flops=2 * b_pad * (D_in * H + H * D_out),
        transcendentals=b_pad * D_out,
        bytes_accessed=(b_pad * D_in * itemsize            # x
                        + b_pad * D_out * 4                # out
                        + (D_in * H + H * D_out) * itemsize  # weights
                        + (H + D_out) * 4),                # biases
    )

    out = pl.pallas_call(
        mlp_kernel,
        out_shape=jax.ShapeDtypeStruct((b_pad, D_out), jnp.float32),
        grid=grid,
        in_specs=[
            pl.BlockSpec((tile, D_in), lambda i: (i, 0)),   # x: tiled over batch
            pl.BlockSpec((D_in, H), lambda i: (0, 0)),      # w1: resident in VMEM
            pl.BlockSpec((1, H), lambda i: (0, 0)),         # b1: resident in VMEM
            pl.BlockSpec((H, D_out), lambda i: (0, 0)),     # w2: resident in VMEM
            pl.BlockSpec((1, D_out), lambda i: (0, 0)),     # b2: resident in VMEM
        ],
        out_specs=pl.BlockSpec((tile, D_out), lambda i: (i, 0)),
        compiler_params=pltpu.CompilerParams(
            dimension_semantics=("parallel",),   # megacore sharding on v7x
            vmem_limit_bytes=32 * 1024 * 1024,   # safe budget for v7x's 64 MiB VMEM
        ),
        cost_estimate=cost,
    )(x_in, w1_in, b1_in, w2_in, b2_in)

    return out[:B]


def init_params(key, input_dim=48, hidden_dim=20, output_dim=2):
    """Deterministic init mirroring PyTorch nn.Linear default (uniform +/- 1/sqrt(fan_in))."""
    k1, k2, k3, k4 = jax.random.split(key, 4)
    bound1 = 1.0 / jnp.sqrt(float(input_dim))
    bound2 = 1.0 / jnp.sqrt(float(hidden_dim))
    # stored as (in, out) so kernel computes x @ W
    w1 = jax.random.uniform(k1, (input_dim, hidden_dim), jnp.float32, -bound1, bound1)
    b1 = jax.random.uniform(k2, (1, hidden_dim), jnp.float32, -bound1, bound1)
    w2 = jax.random.uniform(k3, (hidden_dim, output_dim), jnp.float32, -bound2, bound2)
    b2 = jax.random.uniform(k4, (1, output_dim), jnp.float32, -bound2, bound2)
    return w1, b1, w2, b2


def reference_forward(x, w1, b1, w2, b2):
    h = jnp.maximum(x @ w1 + b1, 0.0)
    return jax.nn.sigmoid(h @ w2 + b2)


if __name__ == "__main__":
    key = jax.random.PRNGKey(0)
    kx, kp, kx2 = jax.random.split(key, 3)

    batch, input_dim, hidden_dim, output_dim = 8, 48, 20, 2
    x = jax.random.normal(kx, (batch, input_dim), jnp.float32)
    w1, b1, w2, b2 = init_params(kp, input_dim, hidden_dim, output_dim)
    ref = reference_forward(x, w1, b1, w2, b2)

    # 1) f32 path, single grid step (small batch).
    out = jax.block_until_ready(net_forward(x, w1, b1, w2, b2))
    assert out.shape == (batch, output_dim)
    assert jnp.allclose(out, ref, atol=1e-5, rtol=1e-5)

    # 2) Multi-step grid + batch padding path (batch=40, tile=16 -> grid of 3).
    x_big = jax.random.normal(kx2, (40, input_dim), jnp.float32)
    ref_big = reference_forward(x_big, w1, b1, w2, b2)
    out_big = jax.block_until_ready(
        net_forward(x_big, w1, b1, w2, b2, max_batch_tile=16))
    assert out_big.shape == (40, output_dim)
    assert jnp.allclose(out_big, ref_big, atol=1e-5, rtol=1e-5)

    # 3) bf16-matmul path (bandwidth-optimized for v6e/v7x); looser tolerance.
    out_bf16 = jax.block_until_ready(net_forward(x, w1, b1, w2, b2, use_bf16=True))
    assert jnp.allclose(out_bf16, ref, atol=5e-2, rtol=5e-2)

    print("KERNEL_OK")
</pallas_src>

<mosaic_0001>
module attributes {stable_mosaic.version = 11 : i64} {
  func.func @mlp_kernel(%arg0: i32, %arg1: memref<8x48xf32, #tpu.memory_space<vmem>>, %arg2: memref<48x20xf32, #tpu.memory_space<vmem>>, %arg3: memref<1x20xf32, #tpu.memory_space<vmem>>, %arg4: memref<20x2xf32, #tpu.memory_space<vmem>>, %arg5: memref<1x2xf32, #tpu.memory_space<vmem>>, %arg6: memref<8x2xf32, #tpu.memory_space<vmem>>) attributes {dimension_semantics = [#tpu.dimension_semantics<parallel>], iteration_bounds = array<i64: 1>, scalar_prefetch = 0 : i64, scratch_operands = 0 : i64, tpu.core_type = #tpu.core_type<tc>, window_params = [{transform_indices = @transform_0, window_bounds = array<i64: 8, 48>}, {pipeline_mode = #tpu.pipeline_mode<synchronous>, transform_indices = @transform_1, window_bounds = array<i64: 48, 20>}, {pipeline_mode = #tpu.pipeline_mode<synchronous>, transform_indices = @transform_2, window_bounds = array<i64: 1, 20>}, {pipeline_mode = #tpu.pipeline_mode<synchronous>, transform_indices = @transform_3, window_bounds = array<i64: 20, 2>}, {pipeline_mode = #tpu.pipeline_mode<synchronous>, transform_indices = @transform_4, window_bounds = array<i64: 1, 2>}, {transform_indices = @transform_5, window_bounds = array<i64: 8, 2>}]} {
    %c0 = arith.constant 0 : index
    %c0_0 = arith.constant 0 : index
    %0 = vector.load %arg1[%c0, %c0_0] : memref<8x48xf32, #tpu.memory_space<vmem>>, vector<8x48xf32>
    %c0_1 = arith.constant 0 : index
    %c0_2 = arith.constant 0 : index
    %1 = vector.load %arg2[%c0_1, %c0_2] : memref<48x20xf32, #tpu.memory_space<vmem>>, vector<48x20xf32>
    %cst = arith.constant dense<0.000000e+00> : vector<8x20xf32>
    %2 = tpu.matmul %0, %1, %cst {dimension_numbers = #tpu.dot_dimension_numbers<[1], [0], [0], [1], [0, 0, 1, 1], [], []>} : vector<8x48xf32>, vector<48x20xf32>, vector<8x20xf32> -> vector<8x20xf32>
    %c0_3 = arith.constant 0 : index
    %c0_4 = arith.constant 0 : index
    %3 = vector.load %arg3[%c0_3, %c0_4] : memref<1x20xf32, #tpu.memory_space<vmem>>, vector<1x20xf32>
    %4 = vector.broadcast %3 : vector<1x20xf32> to vector<8x20xf32>
    %5 = arith.addf %2, %4 : vector<8x20xf32>
    %cst_5 = arith.constant 0.000000e+00 : f32
    %6 = vector.broadcast %cst_5 : f32 to vector<8x20xf32>
    %7 = arith.maximumf %5, %6 : vector<8x20xf32>
    %c0_6 = arith.constant 0 : index
    %c0_7 = arith.constant 0 : index
    %8 = vector.load %arg4[%c0_6, %c0_7] : memref<20x2xf32, #tpu.memory_space<vmem>>, vector<20x2xf32>
    %cst_8 = arith.constant dense<0.000000e+00> : vector<8x2xf32>
    %9 = tpu.matmul %7, %8, %cst_8 {dimension_numbers = #tpu.dot_dimension_numbers<[1], [0], [0], [1], [0, 0, 1, 1], [], []>} : vector<8x20xf32>, vector<20x2xf32>, vector<8x2xf32> -> vector<8x2xf32>
    %c0_9 = arith.constant 0 : index
    %c0_10 = arith.constant 0 : index
    %10 = vector.load %arg5[%c0_9, %c0_10] : memref<1x2xf32, #tpu.memory_space<vmem>>, vector<1x2xf32>
    %11 = vector.broadcast %10 : vector<1x2xf32> to vector<8x2xf32>
    %12 = arith.addf %9, %11 : vector<8x2xf32>
    %13 = arith.negf %12 : vector<8x2xf32>
    %14 = math.exp %13 : vector<8x2xf32>
    %cst_11 = arith.constant 1.000000e+00 : f32
    %15 = vector.broadcast %cst_11 : f32 to vector<8x2xf32>
    %16 = arith.addf %15, %14 : vector<8x2xf32>
    %17 = arith.divf %15, %16 : vector<8x2xf32>
    %c0_12 = arith.constant 0 : index
    %c0_13 = arith.constant 0 : index
    %18 = vector.load %arg6[%c0_12, %c0_13] : memref<8x2xf32, #tpu.memory_space<vmem>>, vector<8x2xf32>
    tpu.vector_store %arg6[%c0_12, %c0_13], %17 {strides = array<i32>} : memref<8x2xf32, #tpu.memory_space<vmem>>, vector<8x2xf32>,
    return
  }
  func.func @transform_0(%arg0: i32) -> (i32, i32) {
    %c0_i32 = arith.constant 0 : i32
    %c0_i32_0 = arith.constant 0 : i32
    return %arg0, %c0_i32 : i32, i32
  }
  func.func @transform_1(%arg0: i32) -> (i32, i32) {
    %c0_i32 = arith.constant 0 : i32
    %c0_i32_0 = arith.constant 0 : i32
    %c0_i32_1 = arith.constant 0 : i32
    return %c0_i32, %c0_i32_0 : i32, i32
  }
  func.func @transform_2(%arg0: i32) -> (i32, i32) {
    %c0_i32 = arith.constant 0 : i32
    %c0_i32_0 = arith.constant 0 : i32
    %c0_i32_1 = arith.constant 0 : i32
    return %c0_i32, %c0_i32_0 : i32, i32
  }
  func.func @transform_3(%arg0: i32) -> (i32, i32) {
    %c0_i32 = arith.constant 0 : i32
    %c0_i32_0 = arith.constant 0 : i32
    %c0_i32_1 = arith.constant 0 : i32
    return %c0_i32, %c0_i32_0 : i32, i32
  }
  func.func @transform_4(%arg0: i32) -> (i32, i32) {
    %c0_i32 = arith.constant 0 : i32
    %c0_i32_0 = arith.constant 0 : i32
    %c0_i32_1 = arith.constant 0 : i32
    return %c0_i32, %c0_i32_0 : i32, i32
  }
  func.func @transform_5(%arg0: i32) -> (i32, i32) {
    %c0_i32 = arith.constant 0 : i32
    %c0_i32_0 = arith.constant 0 : i32
    return %arg0, %c0_i32 : i32, i32
  }
}

</mosaic_0001>

<bundles_post_ra>
// kernel: tpu_custom_call.1
= control target key start
LH: loop header
LB: loop body
LE: loop exit
PB: predicated region body
PF: predicated region fallthrough
CT: control target
= control target key end

     0   :  { %v269_v0 = vmov 0.0|0.0   ;;  %vm270_vm0 = vmmov 0   ;;  %v271_v4 = vmov 0.0   ;;  %vm34_vm1 = vcmask 392192   ;;  %s341_s1 = inlined_call_operand.vmem [shape: f32[48,20], index: 1, kind: input, shape index: {}]   ;;  %s342_s0 = inlined_call_operand.vmem [shape: f32[8,48], index: 0, kind: input, shape index: {}]   ;;  %s343_s3 = inlined_call_operand.vmem [shape: f32[20,2], index: 3, kind: input, shape index: {}]   ;;  %s344_s2 = inlined_call_operand.vmem [shape: f32[1,20], index: 2, kind: input, shape index: {}]   ;;  %s345_s4 = inlined_call_operand.vmem [shape: f32[1,2], index: 4, kind: input, shape index: {}]   ;;  %s346_s5 = inlined_call_operand.vmem [shape: f32[8,2], index: 5, kind: output, shape index: {}]  }
   0x1   :  { %250 = vmatprep.subr.bf16.mxu0 %v269_v0  ;;  %v21_v1 = vld [vmem:[%s341_s1] sm:$0xff]  ;;  %v22_v2 = vld [vmem:[%s341_s1 + $0x8] sm:$0xff]  ;;  %v23_v3 = vld [vmem:[%s341_s1 + $0x10] sm:$0xff]  ;;  %238 = vmatprep.mubr.msk.f32.mxu0 %vm270_vm0, %v271_v4  ;;  %vm123_vm2 = vcmask 1043456   ;;  %vm119_vm3 = vcmask 162816   ;;  %vm203_vm4 = vcmask 15360  }
   0x2   :  { %v251_v5 = vpack.c.bf16 %v22_v2, %v21_v1  ;;  %v24_v6 = vld [vmem:[%s341_s1 + $0x18] sm:$0xff]  ;;  %259 = vmatprep.subr.bf16.mxu1 %v269_v0  ;;  %247 = vmatprep.mubr.msk.f32.mxu1 %vm270_vm0, %v271_v4  ;;  %v25_v8 = vld [vmem:[%s341_s1 + $0x20] sm:$0xff]  ;;  %v26_v9 = vld [vmem:[%s341_s1 + $0x28] sm:$0xff] }
   0x3   :  { %v254_v7 = vpack.c.bf16 %v24_v6, %v23_v3  ;;  %v257_v10 = vpack.c.bf16 %v26_v9, %v25_v8  ;;  %v20_v11 = vld [vmem:[%s342_s0] sm:$0xff]  ;;  %v110_v13 = vld [vmem:[%s343_s3 + $0x8] sm:$0xff]  ;;  %v111_v15 = vld [vmem:[%s343_s3 + $0x10] sm:$0xf] }
   0x4   :  { %252 = vmatpush3.bf16.msra.mxu0 %v251_v5  ;;  %v109_v12 = vld [vmem:[%s343_s3] sm:$0xff] }
   0x5   :  { %253 = vmatprep.subr.bf16.mxu0 %v269_v0  ;;  %v260_v14 = vpack.c.bf16 %v110_v13, %v109_v12  ;;  %v209_v16 = vld [vmem:[%s344_s2] ss:$0 sm:$0xff] }
   0x6   :  { %v211_v21 = vld [vmem:[%s345_s4] ss:$0 sm:$0xff] }
   0x7   :  { %261 = vmatpush3.bf16.msra.mxu1 %v260_v14 }
   0x8   :  { %255 = vmatpush3.bf16.msra.mxu0 %v254_v7  ;;  %245 = vmatprep.subr.mxu1 %v271_v4 }
   0x9   :  { %256 = vmatprep.subr.bf16.mxu0 %v269_v0 }
   0xb   :  { %246 = vmatpush3.msk.msra.mxu1 %vm123_vm2, %v111_v15 }
   0xc   :  { %258 = vmatpush3.bf16.msra.mxu0 %v257_v10 }
   0xf   :  { %239 = vmatmul.mubr.msk.f32.vlgmr.msra.gmra.mrb[0].mxu0 %vm34_vm1, %v20_v11 }
  0xe2   :  { %v104_v17 = vpop.f32.mrb[0].mxu0 }
  0xe3   :  { %v105_v18 = vadd.f32 %v209_v16, %v104_v17  ;;  %v240_v19 = vpop.f32.mrb[1].mxu0 }
  0xe5   :  { %v108_v20 = vmax.f32 %v105_v18, 0.0 }
  0xe7   :  { %248 = vmatmul.mubr.msk.f32.vlgmr.msra.gmra.mrb[0].mxu1 %vm119_vm3, %v108_v20 }
 0x1ba   :  { %v193_v22 = vpop.f32.mrb[0].mxu1 }
 0x1bb   :  { %v194_v23 = vadd.f32 %v211_v21, %v193_v22  ;;  %v249_v24 = vpop.f32.mrb[1].mxu1 }
 0x1bd   :  { %v214_v25 = vmul.f32 -1.442695, %v194_v23 }
 0x1bf   :  { %265 = vpow2.f32 %v214_v25 }
 0x1c9   :  { %v266_v26 = vpop.eup %265 }
 0x1ca   :  { %v200_v27 = vadd.f32 1.0, %v266_v26 }
 0x1cc   :  { %267 = vrcp.f32 %v200_v27 }
 0x1d6   :  { %v268_v28 = vpop.eup %267 }
 0x1d7   :  { %204 = vst.msk [vmem:[%s346_s5] sm:$0xff] %vm203_vm4, %v268_v28 }

</bundles_post_ra>
